<compile_context>
chip_gen: v7x
topology: tpu7x:2x2x1
jax: 0.10.0
libtpu: 0.0.40
codegen_flags: <defaults>
</compile_context>

<pallas_src>
import jax
import jax.numpy as jnp
from jax.experimental import pallas as pl
from jax.experimental.pallas import tpu as pltpu

# Logical (torch) hidden widths and their MXU/lane-padded counterparts.
H1_LOGICAL = 250
H2_LOGICAL = 100
H1 = 256
H2 = 128

LANE = 128
SUBLANE = 8
MAX_TILE_B = 512


def _round_up(n, m):
    return ((n + m - 1) // m) * m


def _pad2d(a, rows, cols):
    """Zero-pad a 2-D array up to (rows, cols); no-op if already that shape."""
    pr, pc = rows - a.shape[0], cols - a.shape[1]
    if pr == 0 and pc == 0:
        return a
    return jnp.pad(a, ((0, pr), (0, pc)))


def mpl_kernel(x_ref, w1_ref, b1_ref, w2_ref, b2_ref, w3_ref, b3_ref, o_ref):
    # x: (TILE_B, D_pad), w1: (D_pad, 256), w2: (256, 128), w3: (128, O_pad)
    x = x_ref[...]
    h1 = jnp.dot(x, w1_ref[...], preferred_element_type=jnp.float32) + b1_ref[...]
    h1 = jnp.maximum(h1, 0.0)                      # f32 ReLU on the VPU (v5e-safe)
    h2 = jnp.dot(h1, w2_ref[...], preferred_element_type=jnp.float32) + b2_ref[...]
    h2 = jnp.maximum(h2, 0.0)
    out = jnp.dot(h2, w3_ref[...], preferred_element_type=jnp.float32) + b3_ref[...]
    o_ref[...] = out.astype(o_ref.dtype)           # lane-dense (TILE_B, O_pad) store


def mplnet_forward(x, params, *, tile_b=MAX_TILE_B):
    """x: (B, ...) -> (B, output_dim). Flattened to (B, input_dim) like torch .view()."""
    w1, b1, w2, b2, w3, b3 = params
    batch = x.shape[0]
    in_dim = 1
    for d in x.shape[1:]:
        in_dim *= d
    out_dim = w3.shape[1]

    x2d = x.reshape(batch, in_dim).astype(jnp.float32)

    # Pad feature dims to the 128-lane width, batch to the batch tile.
    d_pad = _round_up(in_dim, LANE)
    o_pad = _round_up(out_dim, LANE)
    tb = min(tile_b, _round_up(batch, SUBLANE))    # multiple of 8 (f32 sublane)
    b_pad = _round_up(batch, tb)

    f32 = jnp.float32
    x_p = _pad2d(x2d, b_pad, d_pad)
    w1p = _pad2d(w1.astype(f32), d_pad, H1)
    b1p = _pad2d(b1.astype(f32), 1, H1)
    w2p = _pad2d(w2.astype(f32), H1, H2)
    b2p = _pad2d(b2.astype(f32), 1, H2)
    w3p = _pad2d(w3.astype(f32), H2, o_pad)
    b3p = _pad2d(b3.astype(f32), 1, o_pad)

    resident = lambda i: (0, 0)   # weights/biases: same block every step -> loaded once

    n_tiles = b_pad // tb
    flops = 2 * b_pad * (d_pad * H1 + H1 * H2 + H2 * o_pad)
    bytes_accessed = 4 * (
        b_pad * d_pad + d_pad * H1 + H1 * H2 + H2 * o_pad
        + H1 + H2 + o_pad + b_pad * o_pad
    )

    out_padded = pl.pallas_call(
        mpl_kernel,
        out_shape=jax.ShapeDtypeStruct((b_pad, o_pad), jnp.float32),
        grid_spec=pltpu.PrefetchScalarGridSpec(
            num_scalar_prefetch=0,
            grid=(n_tiles,),
            in_specs=[
                pl.BlockSpec((tb, d_pad), lambda i: (i, 0)),   # x tile (pipelined)
                pl.BlockSpec((d_pad, H1), resident),
                pl.BlockSpec((1, H1), resident),
                pl.BlockSpec((H1, H2), resident),
                pl.BlockSpec((1, H2), resident),
                pl.BlockSpec((H2, o_pad), resident),
                pl.BlockSpec((1, o_pad), resident),
            ],
            out_specs=pl.BlockSpec((tb, o_pad), lambda i: (i, 0)),
        ),
        compiler_params=pltpu.CompilerParams(
            dimension_semantics=("parallel",),     # shard batch tiles across v7x TCs
            vmem_limit_bytes=32 * 1024 * 1024,
        ),
        cost_estimate=pl.CostEstimate(
            flops=flops, transcendentals=0, bytes_accessed=bytes_accessed
        ),
    )(x_p, w1p, b1p, w2p, b2p, w3p, b3p)

    return out_padded[:batch, :out_dim]


def init_params(key, input_dim, output_dim):
    """Deterministic init mimicking nn.Linear default (uniform +/- 1/sqrt(fan_in)).

    Returns logical (unpadded) params; padding to MXU-friendly shapes happens in
    mplnet_forward and is numerically exact.
    """
    def linear(k, fan_in, fan_out):
        kw, kb = jax.random.split(k)
        bound = 1.0 / (fan_in ** 0.5)
        w = jax.random.uniform(kw, (fan_in, fan_out), jnp.float32, -bound, bound)
        b = jax.random.uniform(kb, (1, fan_out), jnp.float32, -bound, bound)
        return w, b

    k1, k2, k3 = jax.random.split(key, 3)
    w1, b1 = linear(k1, input_dim, H1_LOGICAL)
    w2, b2 = linear(k2, H1_LOGICAL, H2_LOGICAL)
    w3, b3 = linear(k3, H2_LOGICAL, output_dim)
    return (w1, b1, w2, b2, w3, b3)


def reference_forward(x, params):
    w1, b1, w2, b2, w3, b3 = params
    x2d = x.reshape(x.shape[0], -1).astype(jnp.float32)
    h1 = jnp.maximum(x2d @ w1 + b1, 0.0)
    h2 = jnp.maximum(h1 @ w2 + b2, 0.0)
    return h2 @ w3 + b3


if __name__ == "__main__":
    key = jax.random.PRNGKey(0)
    k_x, k_p = jax.random.split(key)

    # Small shapes consistent with the module: x is (B, C, H, W), flattened inside
    # forward -> input_dim = C*H*W = 4*16*16 = 1024, output_dim = 10.
    B, C, Hs, Ws = 2, 4, 16, 16
    input_dim = C * Hs * Ws
    output_dim = 10

    x = jax.random.normal(k_x, (B, C, Hs, Ws), jnp.float32)
    params = init_params(k_p, input_dim, output_dim)

    out = mplnet_forward(x, params)
    out = jax.block_until_ready(out)

    ref = reference_forward(x, params)
    assert out.shape == (B, output_dim)
    assert jnp.allclose(out, ref, atol=1e-4, rtol=1e-4)

    print("KERNEL_OK")
</pallas_src>

<mosaic_0001>
module attributes {stable_mosaic.version = 11 : i64} {
  func.func @mpl_kernel(%arg0: i32, %arg1: memref<8x1024xf32, #tpu.memory_space<vmem>>, %arg2: memref<1024x256xf32, #tpu.memory_space<vmem>>, %arg3: memref<1x256xf32, #tpu.memory_space<vmem>>, %arg4: memref<256x128xf32, #tpu.memory_space<vmem>>, %arg5: memref<1x128xf32, #tpu.memory_space<vmem>>, %arg6: memref<128x128xf32, #tpu.memory_space<vmem>>, %arg7: memref<1x128xf32, #tpu.memory_space<vmem>>, %arg8: memref<8x128xf32, #tpu.memory_space<vmem>>) attributes {dimension_semantics = [#tpu.dimension_semantics<parallel>], iteration_bounds = array<i64: 1>, scalar_prefetch = 0 : i64, scratch_operands = 0 : i64, tpu.core_type = #tpu.core_type<tc>, window_params = [{transform_indices = @transform_0, window_bounds = array<i64: 8, 1024>}, {pipeline_mode = #tpu.pipeline_mode<synchronous>, transform_indices = @transform_1, window_bounds = array<i64: 1024, 256>}, {pipeline_mode = #tpu.pipeline_mode<synchronous>, transform_indices = @transform_2, window_bounds = array<i64: 1, 256>}, {pipeline_mode = #tpu.pipeline_mode<synchronous>, transform_indices = @transform_3, window_bounds = array<i64: 256, 128>}, {pipeline_mode = #tpu.pipeline_mode<synchronous>, transform_indices = @transform_4, window_bounds = array<i64: 1, 128>}, {pipeline_mode = #tpu.pipeline_mode<synchronous>, transform_indices = @transform_5, window_bounds = array<i64: 128, 128>}, {pipeline_mode = #tpu.pipeline_mode<synchronous>, transform_indices = @transform_6, window_bounds = array<i64: 1, 128>}, {transform_indices = @transform_7, window_bounds = array<i64: 8, 128>}]} {
    %c0 = arith.constant 0 : index
    %c0_0 = arith.constant 0 : index
    %0 = vector.load %arg1[%c0, %c0_0] : memref<8x1024xf32, #tpu.memory_space<vmem>>, vector<8x1024xf32>
    %c0_1 = arith.constant 0 : index
    %c0_2 = arith.constant 0 : index
    %1 = vector.load %arg2[%c0_1, %c0_2] : memref<1024x256xf32, #tpu.memory_space<vmem>>, vector<1024x256xf32>
    %cst = arith.constant dense<0.000000e+00> : vector<8x256xf32>
    %2 = tpu.matmul %0, %1, %cst {dimension_numbers = #tpu.dot_dimension_numbers<[1], [0], [0], [1], [0, 0, 1, 1], [], []>} : vector<8x1024xf32>, vector<1024x256xf32>, vector<8x256xf32> -> vector<8x256xf32>
    %c0_3 = arith.constant 0 : index
    %c0_4 = arith.constant 0 : index
    %3 = vector.load %arg3[%c0_3, %c0_4] : memref<1x256xf32, #tpu.memory_space<vmem>>, vector<1x256xf32>
    %4 = vector.broadcast %3 : vector<1x256xf32> to vector<8x256xf32>
    %5 = arith.addf %2, %4 : vector<8x256xf32>
    %cst_5 = arith.constant 0.000000e+00 : f32
    %6 = vector.broadcast %cst_5 : f32 to vector<8x256xf32>
    %7 = arith.maximumf %5, %6 : vector<8x256xf32>
    %c0_6 = arith.constant 0 : index
    %c0_7 = arith.constant 0 : index
    %8 = vector.load %arg4[%c0_6, %c0_7] : memref<256x128xf32, #tpu.memory_space<vmem>>, vector<256x128xf32>
    %cst_8 = arith.constant dense<0.000000e+00> : vector<8x128xf32>
    %9 = tpu.matmul %7, %8, %cst_8 {dimension_numbers = #tpu.dot_dimension_numbers<[1], [0], [0], [1], [0, 0, 1, 1], [], []>} : vector<8x256xf32>, vector<256x128xf32>, vector<8x128xf32> -> vector<8x128xf32>
    %c0_9 = arith.constant 0 : index
    %c0_10 = arith.constant 0 : index
    %10 = vector.load %arg5[%c0_9, %c0_10] : memref<1x128xf32, #tpu.memory_space<vmem>>, vector<1x128xf32>
    %11 = vector.broadcast %10 : vector<1x128xf32> to vector<8x128xf32>
    %12 = arith.addf %9, %11 : vector<8x128xf32>
    %cst_11 = arith.constant 0.000000e+00 : f32
    %13 = vector.broadcast %cst_11 : f32 to vector<8x128xf32>
    %14 = arith.maximumf %12, %13 : vector<8x128xf32>
    %c0_12 = arith.constant 0 : index
    %c0_13 = arith.constant 0 : index
    %15 = vector.load %arg6[%c0_12, %c0_13] : memref<128x128xf32, #tpu.memory_space<vmem>>, vector<128x128xf32>
    %cst_14 = arith.constant dense<0.000000e+00> : vector<8x128xf32>
    %16 = tpu.matmul %14, %15, %cst_14 {dimension_numbers = #tpu.dot_dimension_numbers<[1], [0], [0], [1], [0, 0, 1, 1], [], []>} : vector<8x128xf32>, vector<128x128xf32>, vector<8x128xf32> -> vector<8x128xf32>
    %c0_15 = arith.constant 0 : index
    %c0_16 = arith.constant 0 : index
    %17 = vector.load %arg7[%c0_15, %c0_16] : memref<1x128xf32, #tpu.memory_space<vmem>>, vector<1x128xf32>
    %18 = vector.broadcast %17 : vector<1x128xf32> to vector<8x128xf32>
    %19 = arith.addf %16, %18 : vector<8x128xf32>
    %c0_17 = arith.constant 0 : index
    %c0_18 = arith.constant 0 : index
    %20 = vector.load %arg8[%c0_17, %c0_18] : memref<8x128xf32, #tpu.memory_space<vmem>>, vector<8x128xf32>
    tpu.vector_store %arg8[%c0_17, %c0_18], %19 {strides = array<i32>} : memref<8x128xf32, #tpu.memory_space<vmem>>, vector<8x128xf32>,
    return
  }
  func.func @transform_0(%arg0: i32) -> (i32, i32) {
    %c0_i32 = arith.constant 0 : i32
    %c0_i32_0 = arith.constant 0 : i32
    return %arg0, %c0_i32 : i32, i32
  }
  func.func @transform_1(%arg0: i32) -> (i32, i32) {
    %c0_i32 = arith.constant 0 : i32
    %c0_i32_0 = arith.constant 0 : i32
    %c0_i32_1 = arith.constant 0 : i32
    return %c0_i32, %c0_i32_0 : i32, i32
  }
  func.func @transform_2(%arg0: i32) -> (i32, i32) {
    %c0_i32 = arith.constant 0 : i32
    %c0_i32_0 = arith.constant 0 : i32
    %c0_i32_1 = arith.constant 0 : i32
    return %c0_i32, %c0_i32_0 : i32, i32
  }
  func.func @transform_3(%arg0: i32) -> (i32, i32) {
    %c0_i32 = arith.constant 0 : i32
    %c0_i32_0 = arith.constant 0 : i32
    %c0_i32_1 = arith.constant 0 : i32
    return %c0_i32, %c0_i32_0 : i32, i32
  }
  func.func @transform_4(%arg0: i32) -> (i32, i32) {
    %c0_i32 = arith.constant 0 : i32
    %c0_i32_0 = arith.constant 0 : i32
    %c0_i32_1 = arith.constant 0 : i32
    return %c0_i32, %c0_i32_0 : i32, i32
  }
  func.func @transform_5(%arg0: i32) -> (i32, i32) {
    %c0_i32 = arith.constant 0 : i32
    %c0_i32_0 = arith.constant 0 : i32
    %c0_i32_1 = arith.constant 0 : i32
    return %c0_i32, %c0_i32_0 : i32, i32
  }
  func.func @transform_6(%arg0: i32) -> (i32, i32) {
    %c0_i32 = arith.constant 0 : i32
    %c0_i32_0 = arith.constant 0 : i32
    %c0_i32_1 = arith.constant 0 : i32
    return %c0_i32, %c0_i32_0 : i32, i32
  }
  func.func @transform_7(%arg0: i32) -> (i32, i32) {
    %c0_i32 = arith.constant 0 : i32
    %c0_i32_0 = arith.constant 0 : i32
    return %arg0, %c0_i32 : i32, i32
  }
}

</mosaic_0001>

<bundles_post_ra>
// kernel: tpu_custom_call.1
= control target key start
LH: loop header
LB: loop body
LE: loop exit
PB: predicated region body
PF: predicated region fallthrough
CT: control target
= control target key end

     0   :  { %12 = vsyncpa [#allocation3], 0  ;;  %s1523_s0 = inlined_call_operand.hbm [shape: f32[8,1024], index: 0, kind: input, shape index: {}]   ;;  %s1524_s1 = inlined_call_operand.hbm [shape: f32[1024,256], index: 1, kind: input, shape index: {}]   ;;  %s1525_s2 = inlined_call_operand.vmem [shape: f32[1,256], index: 2, kind: input, shape index: {}]   ;;  %s1526_s3 = inlined_call_operand.hbm [shape: f32[256,128], index: 3, kind: input, shape index: {}]   ;;  %s1527_s4 = inlined_call_operand.vmem [shape: f32[1,128], index: 4, kind: input, shape index: {}]   ;;  %s1528_s5 = inlined_call_operand.hbm [shape: f32[128,128], index: 5, kind: input, shape index: {}]   ;;  %s1529_s6 = inlined_call_operand.vmem [shape: f32[1,128], index: 6, kind: input, shape index: {}]   ;;  %s1530_s7 = inlined_call_operand.hbm [shape: f32[8,128], index: 7, kind: output, shape index: {}]  }
   0x1   :  { %13 = vsyncpa [#allocation6], 0 }
   0x2   :  { %14 = vsyncpa [#allocation9], 0 }
   0x3   :  { %15 = vsyncpa [#allocation4], 0  ;;  %s1402_s24 = smov [#allocation5]   ;;  %s1284_s28 = scalar_lea.hbm %s1524_s1, 32768 }
   0x4   :  { %s31_s25 = sshll.u32 %s1402_s24, 4  ;;  %p1285_p0 = scmp.ne.s32.totalorder %s1524_s1, %s1284_s28  ;;  %s32_s25 = int_to_ptr.vmem [resolvable:$true] %s31_s25 }
   0x5   :  { %p1288_p1 = scmp.lt.u32.totalorder %s1284_s28, %s1524_s1 }
   0x7   :  { %p1290_p2 = pnand %p1288_p1, %p1285_p0 }
   0x9   :  { %1293 = shalt.err (!%p1290_p2)
}
   0xa   :  { %s1294_s10 = scalar_lea.vmem %s32_s25, 32768  ;;  %p1299_p4 = scmp.lt.s32.totalorder %s32_s25, %s32_s25 }
   0xb   :  { %p1295_p3 = scmp.ne.s32.totalorder %s32_s25, %s1294_s10  ;;  %p1300_p5 = scmp.lt.s32.totalorder %s1294_s10, %s1294_s10 }
   0xd   :  { %p1301_p6 = por %p1300_p5, %p1299_p4 }
   0xf   :  { %p1302_p7 = pnand %p1301_p6, %p1295_p3 }
  0x11   :  { %1305 = shalt.err (!%p1302_p7)
}
  0x12   :  { %s1403_s11 = smov 256   ;;  %s1404_s12 = smov 16  }
  0x13   :  { %37 = dma.hbm_to_vmem [thread:$0]  %s1524_s1, 32768, %s32_s25, [#allocation6], %s1403_s11, %s1403_s11, %s1404_s12  }
  0x14   :  { %s1405_s15 = smov [#allocation2]   ;;  %s1406_s17 = smov [#allocation7]  }
  0x15   :  { %s22_s16 = sshll.u32 %s1405_s15, 4  ;;  %s45_s18 = sshll.u32 %s1406_s17, 4  ;;  %s23_s16 = int_to_ptr.vmem [resolvable:$true] %s22_s16  ;;  %s46_s18 = int_to_ptr.vmem [resolvable:$true] %s45_s18 }
  0x16   :  { %s1306_s21 = scalar_lea.hbm %s1523_s0, 1024 }
  0x17   :  { %p1307_p8 = scmp.ne.s32.totalorder %s1523_s0, %s1306_s21  ;;  %p1310_p9 = scmp.lt.u32.totalorder %s1306_s21, %s1523_s0 }
  0x19   :  { %p1312_p10 = pnand %p1310_p9, %p1307_p8 }
  0x1b   :  { %1315 = shalt.err (!%p1312_p10)
}
  0x1c   :  { %s1316_s1 = scalar_lea.vmem %s23_s16, 1024  ;;  %p1321_p12 = scmp.lt.s32.totalorder %s23_s16, %s23_s16 }
  0x1d   :  { %p1317_p11 = scmp.ne.s32.totalorder %s23_s16, %s1316_s1  ;;  %p1322_p13 = scmp.lt.s32.totalorder %s1316_s1, %s1316_s1 }
  0x1f   :  { %p1323_p0 = por %p1322_p13, %p1321_p12 }
  0x21   :  { %p1324_p1 = pnand %p1323_p0, %p1317_p11 }
  0x23   :  { %1327 = shalt.err (!%p1324_p1)
}
  0x24   :  { %25 = dma.hbm_to_vmem [thread:$0]  %s1523_s0, 1024, %s23_s16, [#allocation3]  }
  0x25   :  { %s1328_s30 = scalar_lea.hbm %s1526_s3, 4096 }
  0x26   :  { %p1329_p2 = scmp.ne.s32.totalorder %s1526_s3, %s1328_s30  ;;  %p1332_p3 = scmp.lt.u32.totalorder %s1328_s30, %s1526_s3 }
  0x28   :  { %p1334_p4 = pnand %p1332_p3, %p1329_p2 }
  0x2a   :  { %1337 = shalt.err (!%p1334_p4)
}
  0x2b   :  { %s1338_s12 = scalar_lea.vmem %s46_s18, 4096  ;;  %p1343_p6 = scmp.lt.s32.totalorder %s46_s18, %s46_s18 }
  0x2c   :  { %p1339_p5 = scmp.ne.s32.totalorder %s46_s18, %s1338_s12  ;;  %p1344_p7 = scmp.lt.s32.totalorder %s1338_s12, %s1338_s12 }
  0x2e   :  { %p1345_p8 = por %p1344_p7, %p1343_p6 }
  0x30   :  { %p1346_p9 = pnand %p1345_p8, %p1339_p5 }
  0x32   :  { %1349 = shalt.err (!%p1346_p9)
}
  0x33   :  { %s1407_s0 = smov 128   ;;  %s1408_s13 = smov 8  }
  0x34   :  { %51 = dma.hbm_to_vmem [thread:$0]  %s1526_s3, 4096, %s46_s18, [#allocation6], %s1407_s0, %s1407_s0, %s1408_s13  }
  0x35   :  { %s1409_s16 = smov [#allocation8]   ;;  %s1350_s21 = scalar_lea.hbm %s1528_s5, 2048 }
  0x36   :  { %s59_s17 = sshll.u32 %s1409_s16, 4  ;;  %p1351_p10 = scmp.ne.s32.totalorder %s1528_s5, %s1350_s21  ;;  %s60_s17 = int_to_ptr.vmem [resolvable:$true] %s59_s17 }
  0x37   :  { %p1354_p11 = scmp.lt.u32.totalorder %s1350_s21, %s1528_s5 }
  0x39   :  { %p1356_p12 = pnand %p1354_p11, %p1351_p10 }
  0x3b   :  { %1359 = shalt.err (!%p1356_p12)
}
  0x3c   :  { %s1360_s1 = scalar_lea.vmem %s60_s17, 2048  ;;  %p1365_p0 = scmp.lt.s32.totalorder %s60_s17, %s60_s17 }
  0x3d   :  { %p1361_p13 = scmp.ne.s32.totalorder %s60_s17, %s1360_s1  ;;  %p1366_p1 = scmp.lt.s32.totalorder %s1360_s1, %s1360_s1 }
  0x3f   :  { %p1367_p2 = por %p1366_p1, %p1365_p0 }
  0x41   :  { %p1368_p3 = pnand %p1367_p2, %p1361_p13 }
  0x43   :  { %1371 = shalt.err (!%p1368_p3)
}
  0x44   :  { %65 = dma.hbm_to_vmem [thread:$0]  %s1528_s5, 2048, %s60_s17, [#allocation9], %s1407_s0, %s1407_s0, %s1408_s13  }
  0x45   :  { %1394 = dma.done.wait [#allocation3], 1024  }
  0x46   :  { %1395 = vsyncadd [#allocation3], 4294966272 }
  0x47   :  { %1396 = dma.done.wait [#allocation6], 36864  }
  0x48   :  { %1397 = vsyncadd [#allocation6], 4294930432 }
  0x49   :  { %1398 = dma.done.wait [#allocation9], 2048  }
  0x4a   :  { %1399 = vsyncadd [#allocation9], 4294965248  ;;  %v153_v0 = vld [vmem:[#allocation5 + $0x208] sm:$0xff]  ;;  %v155_v1 = vld [vmem:[#allocation5 + $0x218] sm:$0xff]  ;;  %vm1411_vm0 = vmmov 0   ;;  %s1413_s30 = smov [#allocation10]  }
  0x4b   :  { %v152_v2 = vld [vmem:[#allocation5 + $0x200] sm:$0xff]  ;;  %v1016_v3 = vpack.c.bf16 %v155_v1, %v153_v0  ;;  %v154_v4 = vld [vmem:[#allocation5 + $0x210] sm:$0xff]  ;;  %v157_v5 = vld [vmem:[#allocation5 + $0x228] sm:$0xff]  ;;  %s852_s8 = sshll.u32 %s1413_s30, 4  ;;  %s853_s8 = int_to_ptr.vmem [resolvable:$true] %s852_s8 }
  0x4c   :  { %v159_v6 = vld [vmem:[#allocation5 + $0x238] sm:$0xff]  ;;  %v1018_v7 = vpack.c.bf16 %v154_v4, %v152_v2  ;;  %v156_v9 = vld [vmem:[#allocation5 + $0x220] sm:$0xff]  ;;  %v158_v10 = vld [vmem:[#allocation5 + $0x230] sm:$0xff]  ;;  %s1372_s9 = scalar_lea.vmem %s853_s8, 128  ;;  %p1377_p5 = scmp.lt.s32.totalorder %s853_s8, %s853_s8 }
  0x4d   :  { %v1020_v8 = vpack.c.bf16 %v159_v6, %v157_v5  ;;  %v161_v11 = vld [vmem:[#allocation5 + $0x248] sm:$0xff]  ;;  %1017 = vmatprep.subr.bf16.mxu0 %v1016_v3  ;;  %v163_v12 = vld [vmem:[#allocation5 + $0x258] sm:$0xff]  ;;  %v1022_v13 = vpack.c.bf16 %v158_v10, %v156_v9  ;;  %v160_v15 = vld [vmem:[#allocation5 + $0x240] sm:$0xff]  ;;  %p1373_p4 = scmp.ne.s32.totalorder %s853_s8, %s1372_s9  ;;  %p1378_p6 = scmp.lt.s32.totalorder %s1372_s9, %s1372_s9 }
  0x4e   :  { %1019 = vmatpush1.bf16.msra.mxu0 %v1018_v7  ;;  %v1024_v14 = vpack.c.bf16 %v163_v12, %v161_v11  ;;  %v162_v16 = vld [vmem:[#allocation5 + $0x250] sm:$0xff]  ;;  %v165_v17 = vld [vmem:[#allocation5 + $0x268] sm:$0xff]  ;;  %v167_v18 = vld [vmem:[#allocation5 + $0x278] sm:$0xff] }
  0x4f   :  { %1021 = vmatprep.subr.bf16.mxu0 %v1020_v8  ;;  %v1026_v19 = vpack.c.bf16 %v162_v16, %v160_v15  ;;  %v1028_v20 = vpack.c.bf16 %v167_v18, %v165_v17  ;;  %v164_v21 = vld [vmem:[#allocation5 + $0x260] sm:$0xff]  ;;  %v166_v22 = vld [vmem:[#allocation5 + $0x270] sm:$0xff]  ;;  %v169_v23 = vld [vmem:[#allocation5 + $0x288] sm:$0xff]  ;;  %p1379_p7 = por %p1378_p6, %p1377_p5 }
  0x50   :  { %v171_v24 = vld [vmem:[#allocation5 + $0x298] sm:$0xff]  ;;  %v1030_v25 = vpack.c.bf16 %v166_v22, %v164_v21  ;;  %v168_v27 = vld [vmem:[#allocation5 + $0x280] sm:$0xff]  ;;  %v170_v28 = vld [vmem:[#allocation5 + $0x290] sm:$0xff] }
  0x51   :  { %v1032_v26 = vpack.c.bf16 %v171_v24, %v169_v23  ;;  %v173_v29 = vld [vmem:[#allocation5 + $0x2a8] sm:$0xff]  ;;  %v175_v30 = vld [vmem:[#allocation5 + $0x2b8] sm:$0xff]  ;;  %v1034_v31 = vpack.c.bf16 %v170_v28, %v168_v27  ;;  %v172_v33 = vld [vmem:[#allocation5 + $0x2a0] sm:$0xff]  ;;  %p1380_p8 = pnand %p1379_p7, %p1373_p4 }
  0x52   :  { %1023 = vmatpush1.bf16.msra.mxu0 %v1022_v13  ;;  %v1036_v32 = vpack.c.bf16 %v175_v30, %v173_v29  ;;  %v174_v34 = vld [vmem:[#allocation5 + $0x2b0] sm:$0xff]  ;;  %v177_v35 = vld [vmem:[#allocation5 + $0x2c8] sm:$0xff]  ;;  %v179_v36 = vld [vmem:[#allocation5 + $0x2d8] sm:$0xff] }
  0x53   :  { %1025 = vmatprep.subr.bf16.mxu0 %v1024_v14  ;;  %v1038_v37 = vpack.c.bf16 %v174_v34, %v172_v33  ;;  %v1040_v38 = vpack.c.bf16 %v179_v36, %v177_v35  ;;  %v176_v39 = vld [vmem:[#allocation5 + $0x2c0] sm:$0xff]  ;;  %v178_v40 = vld [vmem:[#allocation5 + $0x2d0] sm:$0xff]  ;;  %v83_v41 = vld [vmem:[#allocation2 + $0x18] sm:$0xff] }
  0x54   :  { %v181_v42 = vld [vmem:[#allocation5 + $0x2e8] sm:$0xff]  ;;  %v183_v43 = vld [vmem:[#allocation5 + $0x2f8] sm:$0xff]  ;;  %491 = vmatprep.mubr.f32.mxu0 %v83_v41  ;;  %v1042_v44 = vpack.c.bf16 %v178_v40, %v176_v39  ;;  %v180_v46 = vld [vmem:[#allocation5 + $0x2e0] sm:$0xff] }
  0x55   :  { %v1044_v45 = vpack.c.bf16 %v183_v43, %v181_v42  ;;  %v182_v47 = vld [vmem:[#allocation5 + $0x2f0] sm:$0xff]  ;;  %v185_v48 = vld [vmem:[#allocation5 + $0x308] sm:$0xff]  ;;  %v187_v49 = vld [vmem:[#allocation5 + $0x318] sm:$0xff] }
  0x56   :  { %1027 = vmatpush1.bf16.msra.mxu0 %v1026_v19  ;;  %v1046_v50 = vpack.c.bf16 %v182_v47, %v180_v46  ;;  %v1048_v51 = vpack.c.bf16 %v187_v49, %v185_v48  ;;  %v184_v52 = vld [vmem:[#allocation5 + $0x300] sm:$0xff]  ;;  %v186_v53 = vld [vmem:[#allocation5 + $0x310] sm:$0xff]  ;;  %v189_v54 = vld [vmem:[#allocation5 + $0x328] sm:$0xff] }
  0x57   :  { %1029 = vmatprep.subr.bf16.mxu0 %v1028_v20  ;;  %v191_v55 = vld [vmem:[#allocation5 + $0x338] sm:$0xff]  ;;  %v1050_v56 = vpack.c.bf16 %v186_v53, %v184_v52  ;;  %v188_v58 = vld [vmem:[#allocation5 + $0x320] sm:$0xff]  ;;  %v190_v59 = vld [vmem:[#allocation5 + $0x330] sm:$0xff] }
  0x58   :  { %v1052_v57 = vpack.c.bf16 %v191_v55, %v189_v54  ;;  %v193_v60 = vld [vmem:[#allocation5 + $0x348] sm:$0xff]  ;;  %v195_v61 = vld [vmem:[#allocation5 + $0x358] sm:$0xff]  ;;  %v1054_v62 = vpack.c.bf16 %v190_v59, %v188_v58  ;;  %v192_v0 = vld [vmem:[#allocation5 + $0x340] sm:$0xff] }
  0x59   :  { %v1056_v63 = vpack.c.bf16 %v195_v61, %v193_v60  ;;  %v194_v1 = vld [vmem:[#allocation5 + $0x350] sm:$0xff]  ;;  %v197_v2 = vld [vmem:[#allocation5 + $0x368] sm:$0xff]  ;;  %v199_v3 = vld [vmem:[#allocation5 + $0x378] sm:$0xff] }
  0x5a   :  { %1031 = vmatpush1.bf16.msra.mxu0 %v1030_v25  ;;  %v1058_v4 = vpack.c.bf16 %v194_v1, %v192_v0  ;;  %v1060_v5 = vpack.c.bf16 %v199_v3, %v197_v2  ;;  %v196_v6 = vld [vmem:[#allocation5 + $0x360] sm:$0xff]  ;;  %v198_v7 = vld [vmem:[#allocation5 + $0x370] sm:$0xff]  ;;  %v201_v8 = vld [vmem:[#allocation5 + $0x388] sm:$0xff] }
  0x5b   :  { %1033 = vmatprep.subr.bf16.mxu0 %v1032_v26  ;;  %v203_v9 = vld [vmem:[#allocation5 + $0x398] sm:$0xff]  ;;  %v89_v10 = vld [vmem:[#allocation5 + $0x8] sm:$0xff]  ;;  %v1062_v12 = vpack.c.bf16 %v198_v7, %v196_v6  ;;  %v88_v14 = vld [vmem:[#allocation5] sm:$0xff] }
  0x5c   :  { %v91_v11 = vld [vmem:[#allocation5 + $0x18] sm:$0xff]  ;;  %v90_v15 = vld [vmem:[#allocation5 + $0x10] sm:$0xff]  ;;  %v1064_v16 = vpack.c.bf16 %v203_v9, %v201_v8  ;;  %v200_v17 = vld [vmem:[#allocation5 + $0x380] sm:$0xff] }
  0x5d   :  { %v952_v13 = vpack.c.bf16 %v91_v11, %v89_v10  ;;  %v202_v18 = vld [vmem:[#allocation5 + $0x390] sm:$0xff]  ;;  %v954_v19 = vpack.c.bf16 %v90_v15, %v88_v14  ;;  %v93_v20 = vld [vmem:[#allocation5 + $0x28] sm:$0xff]  ;;  %v207_v22 = vld [vmem:[#allocation5 + $0x3b8] sm:$0xff] }
  0x5e   :  { %1035 = vmatpush1.bf16.msra.mxu0 %v1034_v31  ;;  %v205_v21 = vld [vmem:[#allocation5 + $0x3a8] sm:$0xff]  ;;  %v95_v23 = vld [vmem:[#allocation5 + $0x38] sm:$0xff]  ;;  %v92_v25 = vld [vmem:[#allocation5 + $0x20] sm:$0xff]  ;;  %v1066_v27 = vpack.c.bf16 %v202_v18, %v200_v17 }
  0x5f   :  { %1037 = vmatprep.subr.bf16.mxu0 %v1036_v32  ;;  %953 = vmatprep.subr.bf16.mxu1 %v952_v13  ;;  %v956_v24 = vpack.c.bf16 %v95_v23, %v93_v20  ;;  %v94_v26 = vld [vmem:[#allocation5 + $0x30] sm:$0xff]  ;;  %v204_v28 = vld [vmem:[#allocation5 + $0x3a0] sm:$0xff]  ;;  %v97_v30 = vld [vmem:[#allocation5 + $0x48] sm:$0xff]  ;;  %v1068_v31 = vpack.c.bf16 %v207_v22, %v205_v21 }
  0x60   :  { %955 = vmatpush1.bf16.msra.mxu1 %v954_v19  ;;  %v958_v29 = vpack.c.bf16 %v94_v26, %v92_v25  ;;  %v206_v32 = vld [vmem:[#allocation5 + $0x3b0] sm:$0xff]  ;;  %v209_v33 = vld [vmem:[#allocation5 + $0x3c8] sm:$0xff]  ;;  %v99_v34 = vld [vmem:[#allocation5 + $0x58] sm:$0xff] }
  0x61   :  { %957 = vmatprep.subr.bf16.mxu1 %v956_v24  ;;  %v211_v35 = vld [vmem:[#allocation5 + $0x3d8] sm:$0xff]  ;;  %v960_v36 = vpack.c.bf16 %v99_v34, %v97_v30  ;;  %v101_v40 = vld [vmem:[#allocation5 + $0x68] sm:$0xff]  ;;  %v1070_v42 = vpack.c.bf16 %v206_v32, %v204_v28  ;;  %v208_v43 = vld [vmem:[#allocation5 + $0x3c0] sm:$0xff] }
  0x62   :  { %1039 = vmatpush1.bf16.msra.mxu0 %v1038_v37  ;;  %v96_v37 = vld [vmem:[#allocation5 + $0x40] sm:$0xff]  ;;  %v103_v41 = vld [vmem:[#allocation5 + $0x78] sm:$0xff]  ;;  %v1072_v46 = vpack.c.bf16 %v211_v35, %v209_v33  ;;  %v210_v47 = vld [vmem:[#allocation5 + $0x3d0] sm:$0xff] }
  0x63   :  { %1041 = vmatprep.subr.bf16.mxu0 %v1040_v38  ;;  %v98_v38 = vld [vmem:[#allocation5 + $0x50] sm:$0xff]  ;;  %v213_v48 = vld [vmem:[#allocation5 + $0x3e8] sm:$0xff]  ;;  %v107_v52 = vld [vmem:[#allocation5 + $0x98] sm:$0xff]  ;;  %v1074_v54 = vpack.c.bf16 %v210_v47, %v208_v43 }
  0x64   :  { %959 = vmatpush1.bf16.msra.mxu1 %v958_v29  ;;  %v962_v39 = vpack.c.bf16 %v98_v38, %v96_v37  ;;  %v102_v49 = vld [vmem:[#allocation5 + $0x70] sm:$0xff]  ;;  %v212_v55 = vld [vmem:[#allocation5 + $0x3e0] sm:$0xff]  ;;  %v109_v61 = vld [vmem:[#allocation5 + $0xa8] sm:$0xff] }
  0x65   :  { %961 = vmatprep.subr.bf16.mxu1 %v960_v36  ;;  %v106_v58 = vld [vmem:[#allocation5 + $0x90] sm:$0xff]  ;;  %v219_v0 = vld [vmem:[#allocation5 + $0x418] sm:$0xff]  ;;  %v216_v7 = vld [vmem:[#allocation5 + $0x400] sm:$0xff] }
  0x66   :  { %1043 = vmatpush1.bf16.msra.mxu0 %v1042_v44  ;;  %v964_v44 = vpack.c.bf16 %v103_v41, %v101_v40  ;;  %v214_v60 = vld [vmem:[#allocation5 + $0x3f0] sm:$0xff]  ;;  %v221_v9 = vld [vmem:[#allocation5 + $0x428] sm:$0xff]  ;;  %v223_v10 = vld [vmem:[#allocation5 + $0x438] sm:$0xff] }
  0x67   :  { %1045 = vmatprep.subr.bf16.mxu0 %v1044_v45  ;;  %v100_v45 = vld [vmem:[#allocation5 + $0x60] sm:$0xff]  ;;  %v1078_v2 = vpack.c.bf16 %v214_v60, %v212_v55  ;;  %v218_v8 = vld [vmem:[#allocation5 + $0x410] sm:$0xff]  ;;  %v113_v11 = vld [vmem:[#allocation5 + $0xc8] sm:$0xff]  ;;  %v1084_v20 = vpack.c.bf16 %v223_v10, %v221_v9 }
  0x68   :  { %963 = vmatpush1.bf16.msra.mxu1 %v962_v39  ;;  %v966_v53 = vpack.c.bf16 %v102_v49, %v100_v45  ;;  %v82_v13 = vld [vmem:[#allocation2 + $0x10] sm:$0xff]  ;;  %v220_v14 = vld [vmem:[#allocation5 + $0x420] sm:$0xff]  ;;  %v85_v21 = vld [vmem:[#allocation2 + $0x28] sm:$0xff] }
  0x69   :  { %965 = vmatprep.subr.bf16.mxu1 %v964_v44  ;;  %v222_v17 = vld [vmem:[#allocation5 + $0x430] sm:$0xff]  ;;  %v112_v18 = vld [vmem:[#allocation5 + $0xc0] sm:$0xff]  ;;  %v117_v23 = vld [vmem:[#allocation5 + $0xe8] sm:$0xff] }
  0x6a   :  { %1047 = vmatpush1.bf16.msra.mxu0 %v1046_v50  ;;  %v215_v50 = vld [vmem:[#allocation5 + $0x3f8] sm:$0xff]  ;;  %v114_v19 = vld [vmem:[#allocation5 + $0xd0] sm:$0xff]  ;;  %v225_v25 = vld [vmem:[#allocation5 + $0x448] sm:$0xff]  ;;  %v1086_v28 = vpack.c.bf16 %v222_v17, %v220_v14 }
  0x6b   :  { %1049 = vmatprep.subr.bf16.mxu0 %v1048_v51  ;;  %v105_v51 = vld [vmem:[#allocation5 + $0x88] sm:$0xff]  ;;  %v1076_v59 = vpack.c.bf16 %v215_v50, %v213_v48  ;;  %v119_v24 = vld [vmem:[#allocation5 + $0xf8] sm:$0xff]  ;;  %v224_v29 = vld [vmem:[#allocation5 + $0x440] sm:$0xff] }
  0x6c   :  { %967 = vmatpush1.bf16.msra.mxu1 %v966_v53  ;;  %v227_v26 = vld [vmem:[#allocation5 + $0x458] sm:$0xff]  ;;  %v980_v30 = vpack.c.bf16 %v119_v24, %v117_v23  ;;  %v118_v32 = vld [vmem:[#allocation5 + $0xf0] sm:$0xff]  ;;  %v121_v35 = vld [vmem:[#allocation5 + $0x108] sm:$0xff] }
  0x6d   :  { %v1088_v33 = vpack.c.bf16 %v227_v26, %v225_v25  ;;  %v226_v34 = vld [vmem:[#allocation5 + $0x450] sm:$0xff]  ;;  %v123_v36 = vld [vmem:[#allocation5 + $0x118] sm:$0xff]  ;;  %v229_v37 = vld [vmem:[#allocation5 + $0x468] sm:$0xff] }
  0x6e   :  { %1051 = vmatpush1.bf16.msra.mxu0 %v1050_v56  ;;  %v968_v56 = vpack.c.bf16 %v107_v52, %v105_v51  ;;  %v231_v38 = vld [vmem:[#allocation5 + $0x478] sm:$0xff]  ;;  %v1090_v40 = vpack.c.bf16 %v226_v34, %v224_v29  ;;  %v228_v41 = vld [vmem:[#allocation5 + $0x460] sm:$0xff]  ;;  %v122_v44 = vld [vmem:[#allocation5 + $0x110] sm:$0xff] }
  0x6f   :  { %1053 = vmatprep.subr.bf16.mxu0 %v1052_v57  ;;  %v104_v57 = vld [vmem:[#allocation5 + $0x80] sm:$0xff]  ;;  %v1092_v45 = vpack.c.bf16 %v231_v38, %v229_v37  ;;  %v125_v47 = vld [vmem:[#allocation5 + $0x128] sm:$0xff]  ;;  %v127_v48 = vld [vmem:[#allocation5 + $0x138] sm:$0xff] }
  0x70   :  { %v970_v1 = vpack.c.bf16 %v106_v58, %v104_v57  ;;  %969 = vmatprep.subr.bf16.mxu1 %v968_v56  ;;  %v120_v43 = vld [vmem:[#allocation5 + $0x100] sm:$0xff]  ;;  %v233_v49 = vld [vmem:[#allocation5 + $0x488] sm:$0xff]  ;;  %v235_v50 = vld [vmem:[#allocation5 + $0x498] sm:$0xff] }
  0x71   :  { %v986_v51 = vpack.c.bf16 %v122_v44, %v120_v43  ;;  %v232_v53 = vld [vmem:[#allocation5 + $0x480] sm:$0xff]  ;;  %v126_v56 = vld [vmem:[#allocation5 + $0x130] sm:$0xff]  ;;  %v1096_v57 = vpack.c.bf16 %v235_v50, %v233_v49  ;;  %v131_v60 = vld [vmem:[#allocation5 + $0x158] sm:$0xff] }
  0x72   :  { %1055 = vmatpush1.bf16.msra.mxu0 %v1054_v62  ;;  %v111_v62 = vld [vmem:[#allocation5 + $0xb8] sm:$0xff]  ;;  %971 = vmatpush1.bf16.msra.mxu1 %v970_v1  ;;  %v124_v55 = vld [vmem:[#allocation5 + $0x120] sm:$0xff]  ;;  %v234_v58 = vld [vmem:[#allocation5 + $0x490] sm:$0xff] }
  0x73   :  { %1057 = vmatprep.subr.bf16.mxu0 %v1056_v63  ;;  %v217_v63 = vld [vmem:[#allocation5 + $0x408] sm:$0xff]  ;;  %v972_v3 = vpack.c.bf16 %v111_v62, %v109_v61  ;;  %v239_v62 = vld [vmem:[#allocation5 + $0x4b8] sm:$0xff]  ;;  %v236_v1 = vld [vmem:[#allocation5 + $0x4a0] sm:$0xff] }
  0x74   :  { %v1080_v6 = vpack.c.bf16 %v219_v0, %v217_v63  ;;  %v237_v61 = vld [vmem:[#allocation5 + $0x4a8] sm:$0xff]  ;;  %v990_v63 = vpack.c.bf16 %v126_v56, %v124_v55  ;;  %v1098_v0 = vpack.c.bf16 %v234_v58, %v232_v53  ;;  %v243_v10 = vld [vmem:[#allocation5 + $0x4d8] sm:$0xff]  ;;  %v242_v14 = vld [vmem:[#allocation5 + $0x4d0] sm:$0xff] }
  0x75   :  { %973 = vmatprep.subr.bf16.mxu1 %v972_v3  ;;  %v128_v3 = vld [vmem:[#allocation5 + $0x140] sm:$0xff]  ;;  %v241_v9 = vld [vmem:[#allocation5 + $0x4c8] sm:$0xff]  ;;  %v134_v17 = vld [vmem:[#allocation5 + $0x170] sm:$0xff] }
  0x76   :  { %1059 = vmatpush1.bf16.msra.mxu0 %v1058_v4  ;;  %v108_v4 = vld [vmem:[#allocation5 + $0xa0] sm:$0xff]  ;;  %v247_v23 = vld [vmem:[#allocation5 + $0x4f8] sm:$0xff]  ;;  %v138_v29 = vld [vmem:[#allocation5 + $0x190] sm:$0xff] }
  0x77   :  { %1061 = vmatprep.subr.bf16.mxu0 %v1060_v5  ;;  %v110_v5 = vld [vmem:[#allocation5 + $0xb0] sm:$0xff]  ;;  %v244_v26 = vld [vmem:[#allocation5 + $0x4e0] sm:$0xff]  ;;  %v249_v34 = vld [vmem:[#allocation5 + $0x508] sm:$0xff] }
  0x78   :  { %v974_v15 = vpack.c.bf16 %v110_v5, %v108_v4  ;;  %v130_v4 = vld [vmem:[#allocation5 + $0x150] sm:$0xff]  ;;  %v1100_v5 = vpack.c.bf16 %v239_v62, %v237_v61  ;;  %v248_v38 = vld [vmem:[#allocation5 + $0x500] sm:$0xff]  ;;  %v145_v44 = vld [vmem:[#allocation5 + $0x1c8] sm:$0xff] }
  0x79   :  { %v250_v43 = vld [vmem:[#allocation5 + $0x510] sm:$0xff]  ;;  %v252_v50 = vld [vmem:[#allocation5 + $0x520] sm:$0xff]  ;;  %v149_v56 = vld [vmem:[#allocation5 + $0x1e8] sm:$0xff] }
  0x7a   :  { %1063 = vmatpush1.bf16.msra.mxu0 %v1062_v12  ;;  %v115_v12 = vld [vmem:[#allocation5 + $0xd8] sm:$0xff]  ;;  %975 = vmatpush1.bf16.msra.mxu1 %v974_v15  ;;  %v1114_v49 = vpack.c.bf16 %v250_v43, %v248_v38  ;;  %v146_v53 = vld [vmem:[#allocation5 + $0x1d0] sm:$0xff]  ;;  %v257_v58 = vld [vmem:[#allocation5 + $0x548] sm:$0xff] }
  0x7b   :  { %1065 = vmatprep.subr.bf16.mxu0 %v1064_v16  ;;  %v1082_v16 = vpack.c.bf16 %v218_v8, %v216_v7  ;;  %v976_v22 = vpack.c.bf16 %v115_v12, %v113_v11  ;;  %v133_v7 = vld [vmem:[#allocation5 + $0x168] sm:$0xff]  ;;  %v135_v8 = vld [vmem:[#allocation5 + $0x178] sm:$0xff]  ;;  %v240_v11 = vld [vmem:[#allocation5 + $0x4c0] sm:$0xff]  ;;  %v994_v12 = vpack.c.bf16 %v130_v4, %v128_v3 }
  0x7c   :  { %v996_v15 = vpack.c.bf16 %v135_v8, %v133_v7  ;;  %v1106_v25 = vpack.c.bf16 %v242_v14, %v240_v11  ;;  %v254_v55 = vld [vmem:[#allocation5 + $0x530] sm:$0xff]  ;;  %v256_v62 = vld [vmem:[#allocation5 + $0x540] sm:$0xff]  ;;  %v263_v7 = vld [vmem:[#allocation5 + $0x578] sm:$0xff] }
  0x7d   :  { %977 = vmatprep.subr.bf16.mxu1 %v976_v22  ;;  %v245_v22 = vld [vmem:[#allocation5 + $0x4e8] sm:$0xff]  ;;  %v1118_v61 = vpack.c.bf16 %v254_v55, %v252_v50  ;;  %v258_v3 = vld [vmem:[#allocation5 + $0x550] sm:$0xff]  ;;  %v658_v4 = vld [vmem:[#allocation7 + $0x80] sm:$0xff] }
  0x7e   :  { %1067 = vmatpush1.bf16.msra.mxu0 %v1066_v27  ;;  %v978_v27 = vpack.c.bf16 %v114_v19, %v112_v18  ;;  %v1104_v18 = vpack.c.bf16 %v243_v10, %v241_v9  ;;  %v137_v19 = vld [vmem:[#allocation5 + $0x188] sm:$0xff]  ;;  %v1122_v9 = vpack.c.bf16 %v258_v3, %v256_v62  ;;  %v260_v10 = vld [vmem:[#allocation5 + $0x560] sm:$0xff]  ;;  %v649_v50 = vld [vmem:[#allocation7 + $0x38] sm:$0xff] }
  0x7f   :  { %1069 = vmatprep.subr.bf16.mxu0 %v1068_v31  ;;  %v116_v31 = vld [vmem:[#allocation5 + $0xe0] sm:$0xff]  ;;  %v647_v38 = vld [vmem:[#allocation7 + $0x28] sm:$0xff] }
  0x80   :  { %979 = vmatpush1.bf16.msra.mxu1 %v978_v27  ;;  %v982_v39 = vpack.c.bf16 %v118_v32, %v116_v31  ;;  %v246_v31 = vld [vmem:[#allocation5 + $0x4f0] sm:$0xff]  ;;  %v141_v32 = vld [vmem:[#allocation5 + $0x1a8] sm:$0xff] }
  0x81   :  { %981 = vmatprep.subr.bf16.mxu1 %v980_v30  ;;  %v1108_v30 = vpack.c.bf16 %v247_v23, %v245_v22  ;;  %v1110_v37 = vpack.c.bf16 %v246_v31, %v244_v26  ;;  %v264_v23 = vld [vmem:[#allocation5 + $0x580] sm:$0xff]  ;;  %v645_v26 = vld [vmem:[#allocation7 + $0x18] sm:$0xff]  ;;  %v269_v31 = vld [vmem:[#allocation5 + $0x5a8] sm:$0xff] }
  0x82   :  { %1071 = vmatpush1.bf16.msra.mxu0 %v1070_v42  ;;  %v984_v42 = vpack.c.bf16 %v123_v36, %v121_v35  ;;  %v251_v35 = vld [vmem:[#allocation5 + $0x518] sm:$0xff]  ;;  %v273_v43 = vld [vmem:[#allocation5 + $0x5c8] sm:$0xff] }
  0x83   :  { %1073 = vmatprep.subr.bf16.mxu0 %v1072_v46  ;;  %v230_v46 = vld [vmem:[#allocation5 + $0x470] sm:$0xff]  ;;  %v277_v55 = vld [vmem:[#allocation5 + $0x5e8] sm:$0xff] }
  0x84   :  { %983 = vmatpush1.bf16.msra.mxu1 %v982_v39  ;;  %v1094_v52 = vpack.c.bf16 %v230_v46, %v228_v41  ;;  %v142_v41 = vld [vmem:[#allocation5 + $0x1b0] sm:$0xff]  ;;  %v253_v46 = vld [vmem:[#allocation5 + $0x528] sm:$0xff] }
  0x85   :  { %985 = vmatprep.subr.bf16.mxu1 %v984_v42  ;;  %v1112_v42 = vpack.c.bf16 %v251_v35, %v249_v34  ;;  %v268_v35 = vld [vmem:[#allocation5 + $0x5a0] sm:$0xff]  ;;  %v651_v62 = vld [vmem:[#allocation7 + $0x48] sm:$0xff] }
  0x86   :  { %1075 = vmatpush1.bf16.msra.mxu0 %v1074_v54  ;;  %v988_v54 = vpack.c.bf16 %v127_v48, %v125_v47  ;;  %v255_v47 = vld [vmem:[#allocation5 + $0x538] sm:$0xff]  ;;  %v281_v3 = vld [vmem:[#allocation5 + $0x608] sm:$0xff] }
  0x87   :  { %1077 = vmatprep.subr.bf16.mxu0 %v1076_v59  ;;  %v129_v59 = vld [vmem:[#allocation5 + $0x148] sm:$0xff] }
  0x88   :  { %987 = vmatpush1.bf16.msra.mxu1 %v986_v51 }
  0x89   :  { %989 = vmatprep.subr.bf16.mxu1 %v988_v54  ;;  %v1116_v54 = vpack.c.bf16 %v255_v47, %v253_v46  ;;  %v272_v47 = vld [vmem:[#allocation5 + $0x5c0] sm:$0xff] }
  0x8a   :  { %1079 = vmatpush1.bf16.msra.mxu0 %v1078_v2  ;;  %v992_v2 = vpack.c.bf16 %v131_v60, %v129_v59  ;;  %v259_v59 = vld [vmem:[#allocation5 + $0x558] sm:$0xff] }
  0x8b   :  { %1081 = vmatprep.subr.bf16.mxu0 %v1080_v6  ;;  %v238_v6 = vld [vmem:[#allocation5 + $0x4b0] sm:$0xff] }
  0x8c   :  { %991 = vmatpush1.bf16.msra.mxu1 %v990_v63 }
  0x8d   :  { %492 = vmatmul.mubr.f32.vlgmr.msra.gmra.mrb[0].mxu0 %v82_v13  ;;  %v1102_v13 = vpack.c.bf16 %v238_v6, %v236_v1  ;;  %993 = vmatprep.subr.bf16.mxu1 %v992_v2  ;;  %v150_v1 = vld [vmem:[#allocation5 + $0x1f0] sm:$0xff]  ;;  %v1120_v2 = vpack.c.bf16 %v259_v59, %v257_v58  ;;  %v261_v6 = vld [vmem:[#allocation5 + $0x568] sm:$0xff]  ;;  %v276_v59 = vld [vmem:[#allocation5 + $0x5e0] sm:$0xff] }
  0x8e   :  { %1083 = vmatpush1.bf16.msra.mxu0 %v1082_v16  ;;  %562 = vmatprep.mubr.f32.mxu0 %v85_v21  ;;  %v132_v16 = vld [vmem:[#allocation5 + $0x160] sm:$0xff]  ;;  %v81_v21 = vld [vmem:[#allocation2 + $0x8] sm:$0xff]  ;;  %v1124_v14 = vpack.c.bf16 %v263_v7, %v261_v6 }
  0x8f   :  { %1085 = vmatprep.subr.bf16.mxu0 %v1084_v20  ;;  %v139_v20 = vld [vmem:[#allocation5 + $0x198] sm:$0xff]  ;;  %420 = vmatprep.mubr.f32.mxu1 %v81_v21  ;;  %v998_v24 = vpack.c.bf16 %v134_v17, %v132_v16  ;;  %v660_v16 = vld [vmem:[#allocation7 + $0x90] sm:$0xff] }
  0x90   :  { %995 = vmatpush1.bf16.msra.mxu1 %v994_v12  ;;  %v1000_v27 = vpack.c.bf16 %v139_v20, %v137_v19  ;;  %v642_v12 = vld [vmem:[#allocation7] sm:$0xff]  ;;  %v661_v17 = vld [vmem:[#allocation7 + $0x98] sm:$0xff] }
  0x91   :  { %997 = vmatprep.subr.bf16.mxu1 %v996_v15  ;;  %v262_v15 = vld [vmem:[#allocation5 + $0x570] sm:$0xff]  ;;  %v267_v19 = vld [vmem:[#allocation5 + $0x598] sm:$0xff]  ;;  %v80_v20 = vld [vmem:[#allocation2] sm:$0xff] }
  0x92   :  { %1087 = vmatpush1.bf16.msra.mxu0 %v1086_v28  ;;  %v136_v28 = vld [vmem:[#allocation5 + $0x180] sm:$0xff]  ;;  %v1126_v22 = vpack.c.bf16 %v262_v15, %v260_v10 }
  0x93   :  { %1089 = vmatprep.subr.bf16.mxu0 %v1088_v33  ;;  %v143_v33 = vld [vmem:[#allocation5 + $0x1b8] sm:$0xff]  ;;  %v1002_v36 = vpack.c.bf16 %v138_v29, %v136_v28  ;;  %v266_v28 = vld [vmem:[#allocation5 + $0x590] sm:$0xff]  ;;  %v662_v29 = vld [vmem:[#allocation7 + $0xa0] sm:$0xff] }
  0x94   :  { %999 = vmatpush1.bf16.msra.mxu1 %v998_v24  ;;  %v1004_v39 = vpack.c.bf16 %v143_v33, %v141_v32  ;;  %v1212_v24 = vpack.c.bf16 %v661_v17, %v660_v16  ;;  %v271_v32 = vld [vmem:[#allocation5 + $0x5b8] sm:$0xff]  ;;  %v1130_v34 = vpack.c.bf16 %v266_v28, %v264_v23  ;;  %v84_v16 = vld [vmem:[#allocation2 + $0x20] sm:$0xff]  ;;  %v293_v28 = vld [vmem:[#allocation5 + $0x668] sm:$0xff] }
  0x95   :  { %1001 = vmatprep.subr.bf16.mxu1 %v1000_v27  ;;  %v291_v23 = vld [vmem:[#allocation5 + $0x658] sm:$0xff] }
  0x96   :  { %1091 = vmatpush1.bf16.msra.mxu0 %v1090_v40  ;;  %v140_v40 = vld [vmem:[#allocation5 + $0x1a0] sm:$0xff] }
  0x97   :  { %1093 = vmatprep.subr.bf16.mxu0 %v1092_v45  ;;  %v147_v45 = vld [vmem:[#allocation5 + $0x1d8] sm:$0xff]  ;;  %v1006_v48 = vpack.c.bf16 %v142_v41, %v140_v40  ;;  %v270_v40 = vld [vmem:[#allocation5 + $0x5b0] sm:$0xff] }
  0x98   :  { %1003 = vmatpush1.bf16.msra.mxu1 %v1002_v36  ;;  %v1008_v51 = vpack.c.bf16 %v147_v45, %v145_v44  ;;  %v664_v41 = vld [vmem:[#allocation7 + $0xb0] sm:$0xff]  ;;  %v275_v44 = vld [vmem:[#allocation5 + $0x5d8] sm:$0xff]  ;;  %v1134_v46 = vpack.c.bf16 %v270_v40, %v268_v35  ;;  %v301_v40 = vld [vmem:[#allocation5 + $0x6a8] sm:$0xff] }
  0x99   :  { %1005 = vmatprep.subr.bf16.mxu1 %v1004_v39  ;;  %v1132_v39 = vpack.c.bf16 %v271_v32, %v269_v31  ;;  %v292_v32 = vld [vmem:[#allocation5 + $0x660] sm:$0xff]  ;;  %v299_v35 = vld [vmem:[#allocation5 + $0x698] sm:$0xff] }
  0x9a   :  { %1095 = vmatpush1.bf16.msra.mxu0 %v1094_v52  ;;  %v144_v52 = vld [vmem:[#allocation5 + $0x1c0] sm:$0xff] }
  0x9b   :  { %1097 = vmatprep.subr.bf16.mxu0 %v1096_v57  ;;  %v151_v57 = vld [vmem:[#allocation5 + $0x1f8] sm:$0xff]  ;;  %v1010_v60 = vpack.c.bf16 %v146_v53, %v144_v52  ;;  %v274_v52 = vld [vmem:[#allocation5 + $0x5d0] sm:$0xff]  ;;  %v666_v53 = vld [vmem:[#allocation7 + $0xc0] sm:$0xff] }
  0x9c   :  { %1007 = vmatpush1.bf16.msra.mxu1 %v1006_v48  ;;  %v1012_v63 = vpack.c.bf16 %v151_v57, %v149_v56  ;;  %v279_v56 = vld [vmem:[#allocation5 + $0x5f8] sm:$0xff]  ;;  %v1138_v58 = vpack.c.bf16 %v274_v52, %v272_v47  ;;  %v309_v52 = vld [vmem:[#allocation5 + $0x6e8] sm:$0xff] }
  0x9d   :  { %1009 = vmatprep.subr.bf16.mxu1 %v1008_v51  ;;  %v1136_v51 = vpack.c.bf16 %v275_v44, %v273_v43  ;;  %v300_v44 = vld [vmem:[#allocation5 + $0x6a0] sm:$0xff]  ;;  %v307_v47 = vld [vmem:[#allocation5 + $0x6d8] sm:$0xff] }
  0x9e   :  { %1099 = vmatpush1.bf16.msra.mxu0 %v1098_v0  ;;  %v148_v0 = vld [vmem:[#allocation5 + $0x1e0] sm:$0xff] }
  0x9f   :  { %1101 = vmatprep.subr.bf16.mxu0 %v1100_v5  ;;  %v659_v5 = vld [vmem:[#allocation7 + $0x88] sm:$0xff]  ;;  %v1014_v8 = vpack.c.bf16 %v150_v1, %v148_v0  ;;  %v278_v0 = vld [vmem:[#allocation5 + $0x5f0] sm:$0xff] }
  0xa0   :  { %1011 = vmatpush1.bf16.msra.mxu1 %v1010_v60  ;;  %v1208_v11 = vpack.c.bf16 %v659_v5, %v658_v4  ;;  %v668_v1 = vld [vmem:[#allocation7 + $0xd0] sm:$0xff]  ;;  %v283_v4 = vld [vmem:[#allocation5 + $0x618] sm:$0xff]  ;;  %v1142_v6 = vpack.c.bf16 %v278_v0, %v276_v59  ;;  %v317_v0 = vld [vmem:[#allocation5 + $0x728] sm:$0xff] }
  0xa1   :  { %1013 = vmatprep.subr.bf16.mxu1 %v1012_v63  ;;  %v1140_v63 = vpack.c.bf16 %v279_v56, %v277_v55  ;;  %v1144_v10 = vpack.c.bf16 %v283_v4, %v281_v3  ;;  %v308_v56 = vld [vmem:[#allocation5 + $0x6e0] sm:$0xff]  ;;  %v315_v59 = vld [vmem:[#allocation5 + $0x718] sm:$0xff] }
  0xa2   :  { %1103 = vmatpush1.bf16.msra.mxu0 %v1102_v13  ;;  %v643_v13 = vld [vmem:[#allocation7 + $0x8] sm:$0xff]  ;;  %v316_v4 = vld [vmem:[#allocation5 + $0x720] sm:$0xff] }
  0xa3   :  { %1105 = vmatprep.subr.bf16.mxu0 %v1104_v18  ;;  %v265_v18 = vld [vmem:[#allocation5 + $0x588] sm:$0xff]  ;;  %v1210_v21 = vpack.c.bf16 %v643_v13, %v642_v12  ;;  %v282_v12 = vld [vmem:[#allocation5 + $0x610] sm:$0xff] }
  0xa4   :  { %1015 = vmatpush1.bf16.msra.mxu1 %v1014_v8  ;;  %v1128_v27 = vpack.c.bf16 %v267_v19, %v265_v18  ;;  %v652_v8 = vld [vmem:[#allocation7 + $0x50] sm:$0xff]  ;;  %v285_v13 = vld [vmem:[#allocation5 + $0x628] sm:$0xff]  ;;  %v284_v19 = vld [vmem:[#allocation5 + $0x620] sm:$0xff] }
  0xa5   :  { %1209 = vmatprep.subr.bf16.mxu1 %v1208_v11  ;;  %v280_v11 = vld [vmem:[#allocation5 + $0x600] sm:$0xff] }
  0xa6   :  { %1107 = vmatpush1.bf16.msra.mxu0 %v1106_v25  ;;  %v644_v25 = vld [vmem:[#allocation7 + $0x10] sm:$0xff]  ;;  %v1146_v17 = vpack.c.bf16 %v282_v12, %v280_v11  ;;  %v325_v12 = vld [vmem:[#allocation5 + $0x768] sm:$0xff] }
  0xa7   :  { %1109 = vmatprep.subr.bf16.mxu0 %v1108_v30  ;;  %v663_v30 = vld [vmem:[#allocation7 + $0xa8] sm:$0xff]  ;;  %421 = vmatmul.mubr.f32.vlgmr.msra.gmra.mrb[0].mxu1 %v80_v20  ;;  %v1214_v33 = vpack.c.bf16 %v645_v26, %v644_v25  ;;  %v286_v20 = vld [vmem:[#allocation5 + $0x630] sm:$0xff]  ;;  %v288_v26 = vld [vmem:[#allocation5 + $0x640] sm:$0xff] }
  0xa8   :  { %1211 = vmatpush3.bf16.msra.mxu1 %v1210_v21  ;;  %v1216_v36 = vpack.c.bf16 %v663_v30, %v662_v29  ;;  %v87_v21 = vld [vmem:[#allocation2 + $0x38] sm:$0xff]  ;;  %v322_v11 = vld [vmem:[#allocation5 + $0x750] sm:$0xff] }
  0xa9   :  { %1213 = vmatprep.subr.bf16.mxu1 %v1212_v24  ;;  %v1150_v24 = vpack.c.bf16 %v286_v20, %v284_v19  ;;  %v295_v29 = vld [vmem:[#allocation5 + $0x678] sm:$0xff] }
  0xaa   :  { %1111 = vmatpush1.bf16.msra.mxu0 %v1110_v37  ;;  %v646_v37 = vld [vmem:[#allocation7 + $0x20] sm:$0xff]  ;;  %v1156_v31 = vpack.c.bf16 %v295_v29, %v293_v28  ;;  %v331_v19 = vld [vmem:[#allocation5 + $0x798] sm:$0xff]  ;;  %v334_v29 = vld [vmem:[#allocation5 + $0x7b0] sm:$0xff] }
  0xab   :  { %1113 = vmatprep.subr.bf16.mxu0 %v1112_v42  ;;  %v665_v42 = vld [vmem:[#allocation7 + $0xb8] sm:$0xff]  ;;  %v1218_v45 = vpack.c.bf16 %v647_v38, %v646_v37  ;;  %v296_v38 = vld [vmem:[#allocation5 + $0x680] sm:$0xff] }
  0xac   :  { %1215 = vmatpush3.bf16.msra.mxu1 %v1214_v33  ;;  %v1220_v48 = vpack.c.bf16 %v665_v42, %v664_v41  ;;  %v294_v33 = vld [vmem:[#allocation5 + $0x670] sm:$0xff]  ;;  %v303_v41 = vld [vmem:[#allocation5 + $0x6b8] sm:$0xff]  ;;  %v332_v28 = vld [vmem:[#allocation5 + $0x7a0] sm:$0xff] }
  0xad   :  { %1217 = vmatprep.subr.bf16.mxu1 %v1216_v36  ;;  %v1158_v36 = vpack.c.bf16 %v294_v33, %v292_v32  ;;  %v1164_v43 = vpack.c.bf16 %v303_v41, %v301_v40  ;;  %v1198_v32 = vpack.c.bf16 %v334_v29, %v332_v28  ;;  %v340_v40 = vld [vmem:[#allocation5 + $0x7e0] sm:$0xff]  ;;  %v342_v41 = vld [vmem:[#allocation5 + $0x7f0] sm:$0xff]  ;;  %v765_v29 = vld [vmem:[#allocation8 + $0x68] sm:$0xff] }
  0xae   :  { %1115 = vmatpush1.bf16.msra.mxu0 %v1114_v49  ;;  %v648_v49 = vld [vmem:[#allocation7 + $0x30] sm:$0xff]  ;;  %v764_v28 = vld [vmem:[#allocation8 + $0x60] sm:$0xff] }
  0xaf   :  { %1117 = vmatprep.subr.bf16.mxu0 %v1116_v54  ;;  %v667_v54 = vld [vmem:[#allocation7 + $0xc8] sm:$0xff]  ;;  %v1222_v57 = vpack.c.bf16 %v649_v50, %v648_v49  ;;  %v304_v50 = vld [vmem:[#allocation5 + $0x6c0] sm:$0xff] }
  0xb0   :  { %1219 = vmatpush3.bf16.msra.mxu1 %v1218_v45  ;;  %v1224_v60 = vpack.c.bf16 %v667_v54, %v666_v53  ;;  %v302_v45 = vld [vmem:[#allocation5 + $0x6b0] sm:$0xff]  ;;  %v311_v53 = vld [vmem:[#allocation5 + $0x6f8] sm:$0xff] }
  0xb1   :  { %1221 = vmatprep.subr.bf16.mxu1 %v1220_v48  ;;  %v1166_v48 = vpack.c.bf16 %v302_v45, %v300_v44  ;;  %v1172_v55 = vpack.c.bf16 %v311_v53, %v309_v52  ;;  %v670_v44 = vld [vmem:[#allocation7 + $0xe0] sm:$0xff]  ;;  %v671_v45 = vld [vmem:[#allocation7 + $0xe8] sm:$0xff]  ;;  %v656_v53 = vld [vmem:[#allocation7 + $0x70] sm:$0xff] }
  0xb2   :  { %1119 = vmatpush1.bf16.msra.mxu0 %v1118_v61  ;;  %v650_v61 = vld [vmem:[#allocation7 + $0x40] sm:$0xff] }
  0xb3   :  { %1121 = vmatprep.subr.bf16.mxu0 %v1120_v2  ;;  %v669_v2 = vld [vmem:[#allocation7 + $0xd8] sm:$0xff]  ;;  %v1226_v5 = vpack.c.bf16 %v651_v62, %v650_v61  ;;  %v312_v62 = vld [vmem:[#allocation5 + $0x700] sm:$0xff] }
  0xb4   :  { %1223 = vmatpush3.bf16.msra.mxu1 %v1222_v57  ;;  %v1228_v7 = vpack.c.bf16 %v669_v2, %v668_v1  ;;  %v310_v57 = vld [vmem:[#allocation5 + $0x6f0] sm:$0xff]  ;;  %v319_v1 = vld [vmem:[#allocation5 + $0x738] sm:$0xff] }
  0xb5   :  { %1225 = vmatprep.subr.bf16.mxu1 %v1224_v60  ;;  %v1174_v60 = vpack.c.bf16 %v310_v57, %v308_v56  ;;  %v1180_v3 = vpack.c.bf16 %v319_v1, %v317_v0  ;;  %v1410_v56 = vmov 0.0|0.0  }
  0xb6   :  { %1123 = vmatpush1.bf16.msra.mxu0 %v1122_v9  ;;  %v653_v9 = vld [vmem:[#allocation7 + $0x58] sm:$0xff] }
  0xb7   :  { %1125 = vmatprep.subr.bf16.mxu0 %v1124_v14  ;;  %v287_v14 = vld [vmem:[#allocation5 + $0x638] sm:$0xff]  ;;  %v1230_v15 = vpack.c.bf16 %v653_v9, %v652_v8 }
  0xb8   :  { %1227 = vmatpush3.bf16.msra.mxu1 %v1226_v5  ;;  %v1148_v18 = vpack.c.bf16 %v287_v14, %v285_v13  ;;  %v318_v5 = vld [vmem:[#allocation5 + $0x730] sm:$0xff]  ;;  %v327_v13 = vld [vmem:[#allocation5 + $0x778] sm:$0xff] }
  0xb9   :  { %1229 = vmatprep.subr.bf16.mxu1 %v1228_v7  ;;  %v323_v7 = vld [vmem:[#allocation5 + $0x758] sm:$0xff]  ;;  %v1182_v8 = vpack.c.bf16 %v318_v5, %v316_v4 }
  0xba   :  { %1127 = vmatpush1.bf16.msra.mxu0 %v1126_v22  ;;  %v289_v22 = vld [vmem:[#allocation5 + $0x648] sm:$0xff] }
  0xbb   :  { %1129 = vmatprep.subr.bf16.mxu0 %v1128_v27  ;;  %v1152_v25 = vpack.c.bf16 %v291_v23, %v289_v22  ;;  %v290_v27 = vld [vmem:[#allocation5 + $0x650] sm:$0xff]  ;;  %v328_v22 = vld [vmem:[#allocation5 + $0x780] sm:$0xff] }
  0xbc   :  { %1231 = vmatpush3.bf16.msra.mxu1 %v1230_v15  ;;  %v1154_v30 = vpack.c.bf16 %v290_v27, %v288_v26  ;;  %v1188_v15 = vpack.c.bf16 %v327_v13, %v325_v12  ;;  %v330_v23 = vld [vmem:[#allocation5 + $0x790] sm:$0xff] }
  0xbd   :  { %v1194_v26 = vpack.c.bf16 %v330_v23, %v328_v22  ;;  %v754_v13 = vld [vmem:[#allocation8 + $0x10] sm:$0xff]  ;;  %v760_v22 = vld [vmem:[#allocation8 + $0x40] sm:$0xff]  ;;  %v761_v23 = vld [vmem:[#allocation8 + $0x48] sm:$0xff] }
  0xbe   :  { %1131 = vmatpush1.bf16.msra.mxu0 %v1130_v34  ;;  %v297_v34 = vld [vmem:[#allocation5 + $0x688] sm:$0xff] }
  0xbf   :  { %1133 = vmatprep.subr.bf16.mxu0 %v1132_v39  ;;  %v1160_v37 = vpack.c.bf16 %v299_v35, %v297_v34  ;;  %v298_v39 = vld [vmem:[#allocation5 + $0x690] sm:$0xff]  ;;  %v336_v34 = vld [vmem:[#allocation5 + $0x7c0] sm:$0xff] }
  0xc0   :  { %v1162_v42 = vpack.c.bf16 %v298_v39, %v296_v38  ;;  %v338_v35 = vld [vmem:[#allocation5 + $0x7d0] sm:$0xff] }
  0xc1   :  { %v1202_v38 = vpack.c.bf16 %v338_v35, %v336_v34  ;;  %v1412_v34 = vmov 0.0  }
  0xc2   :  { %1135 = vmatpush1.bf16.msra.mxu0 %v1134_v46  ;;  %v305_v46 = vld [vmem:[#allocation5 + $0x6c8] sm:$0xff] }
  0xc3   :  { %1137 = vmatprep.subr.bf16.mxu0 %v1136_v51  ;;  %v1168_v49 = vpack.c.bf16 %v307_v47, %v305_v46  ;;  %v306_v51 = vld [vmem:[#allocation5 + $0x6d0] sm:$0xff]  ;;  %v1232_v46 = vpack.c.bf16 %v671_v45, %v670_v44  ;;  %v654_v47 = vld [vmem:[#allocation7 + $0x60] sm:$0xff] }
  0xc4   :  { %v1170_v54 = vpack.c.bf16 %v306_v51, %v304_v50  ;;  %v672_v50 = vld [vmem:[#allocation7 + $0xf0] sm:$0xff]  ;;  %v673_v51 = vld [vmem:[#allocation7 + $0xf8] sm:$0xff] }
  0xc5   :  { %1233 = vmatprep.subr.bf16.mxu1 %v1232_v46  ;;  %v1236_v52 = vpack.c.bf16 %v673_v51, %v672_v50 }
  0xc6   :  { %1139 = vmatpush1.bf16.msra.mxu0 %v1138_v58  ;;  %v313_v58 = vld [vmem:[#allocation5 + $0x708] sm:$0xff] }
  0xc7   :  { %1141 = vmatprep.subr.bf16.mxu0 %v1140_v63  ;;  %v1176_v61 = vpack.c.bf16 %v315_v59, %v313_v58  ;;  %v314_v63 = vld [vmem:[#allocation5 + $0x710] sm:$0xff]  ;;  %v346_v59 = vlaneseq }
  0xc8   :  { %v1178_v2 = vpack.c.bf16 %v314_v63, %v312_v62  ;;  %v344_v62 = vld [vmem:[%s1525_s2] sm:$0x3] }
  0xca   :  { %1143 = vmatpush1.bf16.msra.mxu0 %v1142_v6  ;;  %v321_v6 = vld [vmem:[#allocation5 + $0x748] sm:$0xff] }
  0xcb   :  { %1145 = vmatprep.subr.bf16.mxu0 %v1144_v10  ;;  %v1184_v9 = vpack.c.bf16 %v323_v7, %v321_v6  ;;  %v320_v10 = vld [vmem:[#allocation5 + $0x740] sm:$0xff] }
  0xcc   :  { %v1186_v14 = vpack.c.bf16 %v322_v11, %v320_v10  ;;  %v752_v7 = vld [vmem:[#allocation8] sm:$0xff] }
  0xcd   :  { %563 = vmatmul.mubr.f32.vlgmr.msra.gmra.mrb[0].mxu0 %v84_v16  ;;  %v324_v16 = vld [vmem:[#allocation5 + $0x760] sm:$0xff] }
  0xce   :  { %1147 = vmatpush1.bf16.msra.mxu0 %v1146_v17  ;;  %633 = vmatprep.mubr.f32.mxu0 %v87_v21  ;;  %v326_v17 = vld [vmem:[#allocation5 + $0x770] sm:$0xff] }
  0xcf   :  { %1149 = vmatprep.subr.bf16.mxu0 %v1148_v18  ;;  %v329_v18 = vld [vmem:[#allocation5 + $0x788] sm:$0xff]  ;;  %v1190_v20 = vpack.c.bf16 %v326_v17, %v324_v16  ;;  %v756_v16 = vld [vmem:[#allocation8 + $0x20] sm:$0xff] }
  0xd0   :  { %v1192_v21 = vpack.c.bf16 %v331_v19, %v329_v18  ;;  %v757_v17 = vld [vmem:[#allocation8 + $0x28] sm:$0xff]  ;;  %v758_v19 = vld [vmem:[#allocation8 + $0x30] sm:$0xff] }
  0xd1   :  { %v1247_v18 = vpack.c.bf16 %v757_v17, %v756_v16 }
  0xd2   :  { %1151 = vmatpush1.bf16.msra.mxu0 %v1150_v24  ;;  %v333_v24 = vld [vmem:[#allocation5 + $0x7a8] sm:$0xff] }
  0xd3   :  { %1153 = vmatprep.subr.bf16.mxu0 %v1152_v25  ;;  %v335_v25 = vld [vmem:[#allocation5 + $0x7b8] sm:$0xff] }
  0xd4   :  { %v1196_v27 = vpack.c.bf16 %v335_v25, %v333_v24  ;;  %v1253_v24 = vpack.c.bf16 %v761_v23, %v760_v22  ;;  %v762_v25 = vld [vmem:[#allocation8 + $0x50] sm:$0xff] }
  0xd6   :  { %1155 = vmatpush1.bf16.msra.mxu0 %v1154_v30  ;;  %v337_v30 = vld [vmem:[#allocation5 + $0x7c8] sm:$0xff] }
  0xd7   :  { %1157 = vmatprep.subr.bf16.mxu0 %v1156_v31  ;;  %v339_v31 = vld [vmem:[#allocation5 + $0x7d8] sm:$0xff] }
  0xd8   :  { %v1200_v33 = vpack.c.bf16 %v339_v31, %v337_v30  ;;  %v1259_v30 = vpack.c.bf16 %v765_v29, %v764_v28  ;;  %v766_v31 = vld [vmem:[#allocation8 + $0x70] sm:$0xff] }
  0xda   :  { %1159 = vmatpush1.bf16.msra.mxu0 %v1158_v36  ;;  %v341_v36 = vld [vmem:[#allocation5 + $0x7e8] sm:$0xff] }
  0xdb   :  { %1161 = vmatprep.subr.bf16.mxu0 %v1160_v37  ;;  %v343_v37 = vld [vmem:[#allocation5 + $0x7f8] sm:$0xff] }
  0xdc   :  { %v1204_v39 = vpack.c.bf16 %v343_v37, %v341_v36  ;;  %v863_v36 = vld [vmem:[%s1527_s4] ss:$0 sm:$0xff] }
  0xde   :  { %1163 = vmatpush1.bf16.msra.mxu0 %v1162_v42  ;;  %v1206_v42 = vpack.c.bf16 %v342_v41, %v340_v40  ;;  %v864_v41 = vld [vmem:[%s1529_s6] ss:$0 sm:$0xff] }
  0xdf   :  { %1165 = vmatprep.subr.bf16.mxu0 %v1164_v43  ;;  %v86_v43 = vld [vmem:[#allocation2 + $0x30] sm:$0xff] }
  0xe2   :  { %1167 = vmatpush1.bf16.msra.mxu0 %v1166_v48  ;;  %v655_v48 = vld [vmem:[#allocation7 + $0x68] sm:$0xff] }
  0xe3   :  { %1169 = vmatprep.subr.bf16.mxu0 %v1168_v49  ;;  %v1234_v49 = vpack.c.bf16 %v655_v48, %v654_v47 }
  0xe5   :  { %1235 = vmatpush3.bf16.msra.mxu1 %v1234_v49 }
  0xe6   :  { %1171 = vmatpush1.bf16.msra.mxu0 %v1170_v54  ;;  %v657_v54 = vld [vmem:[#allocation7 + $0x78] sm:$0xff]  ;;  %1237 = vmatprep.subr.bf16.mxu1 %v1236_v52 }
  0xe7   :  { %1173 = vmatprep.subr.bf16.mxu0 %v1172_v55  ;;  %v1238_v55 = vpack.c.bf16 %v657_v54, %v656_v53 }
  0xe9   :  { %1239 = vmatpush3.bf16.msra.mxu1 %v1238_v55 }
  0xea   :  { %1175 = vmatpush1.bf16.msra.mxu0 %v1174_v60  ;;  %1240 = vmatprep.subr.bf16.mxu1 %v1410_v56  ;;  %v347_v60 = vshrl.u32 %v346_v59, 7 }
  0xeb   :  { %1177 = vmatprep.subr.bf16.mxu0 %v1176_v61 }
  0xec   :  { %v348_v61 = vsub.s32 0, %v347_v60  ;;  %v352_v63 = vsub.s32 1, %v347_v60 }
  0xee   :  { %1179 = vmatpush1.bf16.msra.mxu0 %v1178_v2  ;;  %v349_v0 = vrot.slane %v344_v62, %v348_v61  ;;  %v353_v1 = vrot.slane %v344_v62, %v352_v63 }
  0xef   :  { %1181 = vmatprep.subr.bf16.mxu0 %v1180_v3 }
  0xf2   :  { %1183 = vmatpush1.bf16.msra.mxu0 %v1182_v8  ;;  %v753_v8 = vld [vmem:[#allocation8 + $0x8] sm:$0xff] }
  0xf3   :  { %1185 = vmatprep.subr.bf16.mxu0 %v1184_v9  ;;  %v1241_v11 = vpack.c.bf16 %v753_v8, %v752_v7 }
  0xf6   :  { %1187 = vmatpush1.bf16.msra.mxu0 %v1186_v14  ;;  %v755_v14 = vld [vmem:[#allocation8 + $0x18] sm:$0xff] }
  0xf7   :  { %1189 = vmatprep.subr.bf16.mxu0 %v1188_v15  ;;  %v1244_v15 = vpack.c.bf16 %v755_v14, %v754_v13 }
  0xfa   :  { %1191 = vmatpush1.bf16.msra.mxu0 %v1190_v20  ;;  %v759_v20 = vld [vmem:[#allocation8 + $0x38] sm:$0xff] }
  0xfb   :  { %1193 = vmatprep.subr.bf16.mxu0 %v1192_v21  ;;  %v1250_v21 = vpack.c.bf16 %v759_v20, %v758_v19 }
  0xfe   :  { %1195 = vmatpush1.bf16.msra.mxu0 %v1194_v26  ;;  %v763_v26 = vld [vmem:[#allocation8 + $0x58] sm:$0xff] }
  0xff   :  { %1197 = vmatprep.subr.bf16.mxu0 %v1196_v27  ;;  %v1256_v27 = vpack.c.bf16 %v763_v26, %v762_v25 }
 0x102   :  { %1199 = vmatpush1.bf16.msra.mxu0 %v1198_v32  ;;  %v767_v32 = vld [vmem:[#allocation8 + $0x78] sm:$0xff] }
 0x103   :  { %1201 = vmatprep.subr.bf16.mxu0 %v1200_v33  ;;  %v1262_v33 = vpack.c.bf16 %v767_v32, %v766_v31 }
 0x106   :  { %1203 = vmatpush1.bf16.msra.mxu0 %v1202_v38 }
 0x107   :  { %1205 = vmatprep.subr.bf16.mxu0 %v1204_v39 }
 0x10a   :  { %1207 = vmatpush1.bf16.msra.mxu0 %v1206_v42 }
 0x10d   :  { %634 = vmatmul.mubr.f32.vlgmr.msra.gmra.mrb[0].mxu0 %v86_v43 }
 0x17a   :  { %v422_v57 = vpop.f32.mrb[0].mxu1 }
 0x17b   :  { %v424_v58 = vpop.f32.mrb[1].mxu1  ;;  %v423_v2 = vadd.f32 %v422_v57, %v349_v0 }
 0x17c   :  { %v425_v3 = vadd.f32 %v424_v58, %v353_v1 }
 0x1e0   :  { %v635_v4 = vpop.f32.mrb[0].mxu0 }
 0x1e1   :  { %v1265_v5 = vadd.f32 %v635_v4, %v423_v2  ;;  %v637_v6 = vpop.f32.mrb[1].mxu0 }
 0x1e2   :  { %v1267_v9 = vadd.f32 %v637_v6, %v425_v3 }
 0x1e3   :  { %v640_v12 = vmax.f32 %v1265_v5, 0.0 }
 0x1e4   :  { %v641_v10 = vmax.f32 %v1267_v9, 0.0 }
 0x1e6   :  { %745 = vmatprep.mubr.f32.mxu1 %v641_v10 }
 0x1e7   :  { %746 = vmatmul.mubr.f32.vlgmr.msra.gmra.mrb[2].mxu1 %v640_v12 }
 0x1e8   :  { %1242 = vmatpush3.bf16.msra.mxu1 %v1241_v11  ;;  %949 = vmatprep.mubr.msk.f32.mxu1 %vm1411_vm0, %v1412_v34 }
 0x1e9   :  { %1243 = vmatprep.subr.bf16.mxu1 %v1410_v56 }
 0x1ec   :  { %1245 = vmatpush3.bf16.msra.mxu1 %v1244_v15 }
 0x1ed   :  { %1246 = vmatprep.subr.bf16.mxu1 %v1410_v56 }
 0x1f0   :  { %1248 = vmatpush3.bf16.msra.mxu1 %v1247_v18 }
 0x1f1   :  { %1249 = vmatprep.subr.bf16.mxu1 %v1410_v56 }
 0x1f4   :  { %1251 = vmatpush3.bf16.msra.mxu1 %v1250_v21 }
 0x1f5   :  { %1252 = vmatprep.subr.bf16.mxu1 %v1410_v56 }
 0x1f8   :  { %1254 = vmatpush3.bf16.msra.mxu1 %v1253_v24 }
 0x1f9   :  { %1255 = vmatprep.subr.bf16.mxu1 %v1410_v56 }
 0x1fc   :  { %1257 = vmatpush3.bf16.msra.mxu1 %v1256_v27 }
 0x1fd   :  { %1258 = vmatprep.subr.bf16.mxu1 %v1410_v56 }
 0x200   :  { %1260 = vmatpush3.bf16.msra.mxu1 %v1259_v30 }
 0x201   :  { %1261 = vmatprep.subr.bf16.mxu1 %v1410_v56 }
 0x204   :  { %1263 = vmatpush3.bf16.msra.mxu1 %v1262_v33 }
 0x2ba   :  { %v897_v35 = vpop.f32.mrb[2].mxu1 }
 0x2bb   :  { %v898_v37 = vpop.f32.mrb[3].mxu1 }
 0x2bc   :  { %v899_v38 = vadd.f32 %v898_v37, %v897_v35 }
 0x2be   :  { %v748_v39 = vadd.f32 %v899_v38, %v863_v36 }
 0x2c0   :  { %v751_v40 = vmax.f32 %v748_v39, 0.0 }
 0x2c2   :  { %950 = vmatmul.mubr.f32.vlgmr.msra.gmra.mrb[4].mxu1 %v751_v40 }
 0x395   :  { %v841_v42 = vpop.f32.mrb[4].mxu1 }
 0x396   :  { %v842_v43 = vadd.f32 %v864_v41, %v841_v42  ;;  %v951_v44 = vpop.f32.mrb[5].mxu1 }
 0x398   :  { %845 = vst [vmem:[#allocation10] sm:$0xff] %v842_v43 }
 0x399   :  { %1383 = shalt.err (!%p1380_p8)
}
 0x39a   :  { %s1384_s11 = scalar_lea.hbm %s1530_s7, 128 }
 0x39b   :  { %p1385_p9 = scmp.ne.s32.totalorder %s1530_s7, %s1384_s11  ;;  %p1388_p10 = scmp.lt.u32.totalorder %s1384_s11, %s1530_s7 }
 0x39d   :  { %p1390_p11 = pnand %p1388_p10, %p1385_p9 }
 0x39f   :  { %1393 = shalt.err (!%p1390_p11)
}
 0x3a0   :  { %855 = dma.vmem_to_hbm [thread:$0]  %s853_s8, 128, %s1530_s7, [#allocation4]  }
 0x3a1   :  { %1400 = dma.done.wait [#allocation4], 128  }
 0x3a2   :  { %1401 = vsyncadd [#allocation4], 4294967168 }
 0x3a3   :  { %859 = vsyncpa [#allocation3], 1 }
 0x3a4   :  { %860 = vsyncpa [#allocation6], 1 }
 0x3a5   :  { %861 = vsyncpa [#allocation9], 1 }
 0x3a6   :  { %862 = vsyncpa [#allocation4], 1 }

</bundles_post_ra>
